<compile_context>
chip_gen: v6e
topology: v6e:2x2x1
jax: 0.10.0
libtpu: 0.0.40
codegen_flags: <defaults>
</compile_context>

<pallas_src>
import jax
import jax.numpy as jnp
from jax import lax
from jax.experimental import pallas as pl
from jax.experimental.pallas import tpu as pltpu


_HID = 128        # hidden width
_NUM_RES = 3      # number of residual blocks


# --------------------------------------------------------------------------- kernel
def _forward_kernel(x_ref, w1_ref, wres_ref, bhid_ref,
                    w2_ref, w3_ref, w4_ref, wo_ref, btail_ref, o_ref):
    f32, bf16 = jnp.float32, jnp.bfloat16

    def mm(a, w):
        return jnp.dot(a, w, preferred_element_type=f32)   # bf16 MXU, f32 accumulate

    # fc1 (+ folded bn1) -> relu; carry the activation in bf16 (next consumer is a
    # bf16 MXU matmul anyway; halves live intermediate bytes at large tiles).
    h = jnp.maximum(mm(x_ref[...], w1_ref[...]) + bhid_ref[0], 0.0).astype(bf16)

    # 3 x ResidualBlock: relu(h + Linear2'(relu(Linear1(h)))); BN folded into Linear2'.
    for i in range(_NUM_RES):
        y = jnp.maximum(mm(h, wres_ref[2 * i]) + bhid_ref[1 + 2 * i], 0.0).astype(bf16)
        y = mm(y, wres_ref[2 * i + 1]) + bhid_ref[2 + 2 * i]
        h = jnp.maximum(h.astype(f32) + y, 0.0).astype(bf16)   # residual add in f32

    # Tail MLP at true widths (128 -> 64 -> 32 -> 16); biases packed in one lane row.
    h = jnp.maximum(mm(h, w2_ref[...]) + btail_ref[:, 0:64], 0.0).astype(bf16)
    h = jnp.maximum(mm(h, w3_ref[...]) + btail_ref[:, 64:96], 0.0).astype(bf16)
    h = jnp.maximum(mm(h, w4_ref[...]) + btail_ref[:, 96:112], 0.0).astype(bf16)

    # out_delay head as a transposed-RHS matmul: (1,16) x (tile_b,16)^T -> (1,tile_b).
    # The result is lane-dense, so the output writeback is full-width vst.
    head = lax.dot_general(wo_ref[...], h, (((1,), (1,)), ((), ())),
                           preferred_element_type=f32)
    o_ref[0] = head + btail_ref[:, 112:113]


# --------------------------------------------------------------------------- wrapper
def _round_up(n, m):
    return ((n + m - 1) // m) * m


def _choose_tiling(batch, max_tile_b):
    """Pick (tile_b, grid_n, b_pad): tile_b a multiple of 8, remainder balanced across
    tiles (no mostly-padded last tile), and >= 2 grid steps whenever there is enough
    work so v7x's two TensorCores both get fed via the 'parallel' grid axis."""
    b8 = _round_up(max(batch, 1), 8)
    max_tile_b = max(8, _round_up(max_tile_b, 8))
    grid_n = pl.cdiv(b8, max_tile_b)
    if grid_n == 1 and b8 >= 512:
        grid_n = 2                       # keep both v7x TCs busy; cheap on v5e/v6e
    tile_b = _round_up(pl.cdiv(b8, grid_n), 8)
    return tile_b, grid_n, tile_b * grid_n


def delay_predictor_resnet_forward(x, kparams, *, max_tile_b=1024):
    """x: (B, input_dim) float. Returns (B, 1) float32."""
    B, input_dim = x.shape
    tile_b, grid_n, b_pad = _choose_tiling(B, max_tile_b)

    # Pre-cast + pre-pad the activation: halves the only pipelined DMA.
    xb = x.astype(jnp.bfloat16)
    if b_pad != B:
        xb = jnp.pad(xb, ((0, b_pad - B), (0, 0)))

    weights = (kparams["w1"], kparams["wres"], kparams["bhid"],
               kparams["w2"], kparams["w3"], kparams["w4"],
               kparams["wo"], kparams["btail"])

    in_specs = [pl.BlockSpec((tile_b, input_dim), lambda i: (i, 0))]
    for w in weights:   # constant index maps: weights stay VMEM-resident across steps
        in_specs.append(pl.BlockSpec(w.shape, lambda i, _nd=w.ndim: (0,) * _nd))
    out_specs = pl.BlockSpec((1, 1, tile_b), lambda i: (i, 0, 0))

    weight_bytes = sum(int(w.size) * w.dtype.itemsize for w in weights)
    flops = 2 * b_pad * (input_dim * _HID + 2 * _NUM_RES * _HID * _HID
                         + _HID * 64 + 64 * 32 + 32 * 16 + 16)
    cost = pl.CostEstimate(
        flops=int(flops), transcendentals=0,
        bytes_accessed=int(weight_bytes + b_pad * input_dim * 2 + b_pad * 4))

    out = pl.pallas_call(
        _forward_kernel,
        out_shape=jax.ShapeDtypeStruct((grid_n, 1, tile_b), jnp.float32),
        grid=(grid_n,),
        in_specs=in_specs,
        out_specs=out_specs,
        compiler_params=pltpu.CompilerParams(
            # Batch tiles are independent -> megacore / v7x dual-TC sharding.
            # VMEM use is < 1 MiB at tile_b=1024; only set vmem_limit_bytes here if
            # max_tile_b is pushed toward ~8K rows (v7x has 64 MiB physical VMEM).
            dimension_semantics=("parallel",),
        ),
        cost_estimate=cost,
    )(xb, *weights)

    return out.reshape(-1)[:B].reshape(B, 1)


# --------------------------------------------------------------------------- params
def _fold_bn(gamma, beta, mean, var, eps=1e-5):
    scale = gamma / jnp.sqrt(var + eps)
    shift = beta - mean * scale
    return scale, shift


def make_raw_params(key, input_dim):
    """Synthetic f32 parameters matching DelayPredictorResNet(input_dim).
    Linear weights stored as (in_features, out_features) for right-multiplication."""
    keys = iter(jax.random.split(key, 80))

    def lin(n_in, n_out):
        w = jax.random.normal(next(keys), (n_in, n_out), jnp.float32) * 0.05
        b = jax.random.normal(next(keys), (1, n_out), jnp.float32) * 0.05
        return w, b

    def bn(shape):
        gamma = 1.0 + 0.1 * jax.random.normal(next(keys), shape, jnp.float32)
        beta = 0.1 * jax.random.normal(next(keys), shape, jnp.float32)
        rmean = 0.1 * jax.random.normal(next(keys), shape, jnp.float32)
        rvar = 1.0 + 0.1 * jax.random.uniform(next(keys), shape, jnp.float32)
        return gamma, beta, rmean, rvar

    raw = {}
    raw["w1"], raw["b1"] = lin(input_dim, _HID)
    raw["bn1"] = bn((1, _HID))

    rwa, rba, rwb, rbb, rbn = [], [], [], [], []
    for _ in range(_NUM_RES):
        wa, ba = lin(_HID, _HID)
        wb, bb = lin(_HID, _HID)
        rwa.append(wa); rba.append(ba); rwb.append(wb); rbb.append(bb)
        rbn.append(bn((1, _HID)))
    raw["rwa"] = jnp.stack(rwa)                              # (3, 128, 128)
    raw["rba"] = jnp.stack(rba)                              # (3, 1, 128)
    raw["rwb"] = jnp.stack(rwb)
    raw["rbb"] = jnp.stack(rbb)
    raw["rbn"] = tuple(jnp.stack([rbn[i][j] for i in range(_NUM_RES)])  # 4 x (3,1,128)
                       for j in range(4))

    raw["w2"], raw["b2"] = lin(_HID, 64)
    raw["w3"], raw["b3"] = lin(64, 32)
    raw["w4"], raw["b4"] = lin(32, 16)
    raw["wo"], raw["bo"] = lin(16, 1)
    return raw


def prepare_kernel_params(raw):
    """Fold eval-mode BatchNorm into adjacent Linears, pack weights/biases into a few
    VMEM-resident slabs, cast matmul weights to bf16 (biases stay f32)."""
    bf16 = jnp.bfloat16

    # fc1 -> bn1: column-scale the fc1 weight, fold the shift into its bias.
    s1, t1 = _fold_bn(*raw["bn1"])
    w1 = (raw["w1"] * s1).astype(bf16)                      # (input_dim, 128)
    b1 = raw["b1"] * s1 + t1                                # (1, 128)

    # ResidualBlock: Linear -> ReLU -> BN -> Linear.  Fold BN into the second Linear
    # (row-scale of its weight + bias correction).
    rs, rt = _fold_bn(*raw["rbn"])                          # (3,1,128) each
    rwa = raw["rwa"].astype(bf16)
    rwb = (raw["rwb"] * jnp.swapaxes(rs, 1, 2)).astype(bf16)
    rba = raw["rba"]
    rbb = raw["rbb"] + jnp.matmul(rt, raw["rwb"])           # (3,1,128)

    # Packed slabs: one bf16 weight stack and one f32 bias stack (fewer DMA descriptors).
    wres = jnp.stack([rwa[0], rwb[0], rwa[1], rwb[1], rwa[2], rwb[2]])      # (6,128,128)
    bhid = jnp.stack([b1, rba[0], rbb[0], rba[1], rbb[1], rba[2], rbb[2]])  # (7,1,128)

    # Tail Linears at true shapes (no zero padding -> no wasted MXU work).
    w2 = raw["w2"].astype(bf16)         # (128, 64)
    w3 = raw["w3"].astype(bf16)         # (64, 32)
    w4 = raw["w4"].astype(bf16)         # (32, 16)
    wo = raw["wo"].T.astype(bf16)       # (1, 16) row for the transposed-RHS head matmul

    # Tail + head biases packed into one (1,128) f32 lane row:
    # [0:64]=b2, [64:96]=b3, [96:112]=b4, [112]=bo.
    btail = jnp.zeros((1, 128), jnp.float32)
    btail = btail.at[:, 0:64].set(raw["b2"])
    btail = btail.at[:, 64:96].set(raw["b3"])
    btail = btail.at[:, 96:112].set(raw["b4"])
    btail = btail.at[:, 112:113].set(raw["bo"])

    return {"w1": w1, "wres": wres, "bhid": bhid,
            "w2": w2, "w3": w3, "w4": w4, "wo": wo, "btail": btail}


# --------------------------------------------------------------------------- reference
def reference_forward(x, raw):
    """Pure-JAX reference of DelayPredictorResNet.forward (eval-mode BN).
    Matmuls use bf16 operands with f32 accumulation to mirror the kernel numerics."""
    f32, bf16 = jnp.float32, jnp.bfloat16

    def mm(a, w):
        return jnp.dot(a.astype(bf16), w.astype(bf16), preferred_element_type=f32)

    def bn(v, stats, eps=1e-5):
        g, b, m, var = stats
        return (v - m) * (g / jnp.sqrt(var + eps)) + b

    h = jnp.maximum(bn(mm(x, raw["w1"]) + raw["b1"], raw["bn1"]), 0.0)
    rg, rb, rm, rv = raw["rbn"]
    for i in range(_NUM_RES):
        y = jnp.maximum(mm(h, raw["rwa"][i]) + raw["rba"][i], 0.0)
        y = bn(y, (rg[i], rb[i], rm[i], rv[i]))
        y = mm(y, raw["rwb"][i]) + raw["rbb"][i]
        h = jnp.maximum(h + y, 0.0)
    h = jnp.maximum(mm(h, raw["w2"]) + raw["b2"], 0.0)
    h = jnp.maximum(mm(h, raw["w3"]) + raw["b3"], 0.0)
    h = jnp.maximum(mm(h, raw["w4"]) + raw["b4"], 0.0)
    return (mm(h, raw["wo"]) + raw["bo"]).reshape(-1, 1)


# --------------------------------------------------------------------------- main
if __name__ == "__main__":
    key = jax.random.PRNGKey(0)
    k_x, k_p = jax.random.split(key)

    batch = 8
    input_dim = 32
    x = jax.random.normal(k_x, (batch, input_dim), jnp.float32)

    raw = make_raw_params(k_p, input_dim)
    kparams = prepare_kernel_params(raw)

    out = jax.block_until_ready(delay_predictor_resnet_forward(x, kparams))
    ref = jax.block_until_ready(reference_forward(x, raw))

    assert out.shape == (batch, 1), out.shape
    max_err = float(jnp.max(jnp.abs(out - ref)))
    assert jnp.allclose(out, ref, atol=2e-2, rtol=2e-2), max_err
    print("KERNEL_OK")
</pallas_src>

<mosaic_0001>
module attributes {stable_mosaic.version = 11 : i64} {
  func.func @_forward_kernel(%arg0: i32, %arg1: memref<8x32xbf16, #tpu.memory_space<vmem>>, %arg2: memref<32x128xbf16, #tpu.memory_space<vmem>>, %arg3: memref<6x128x128xbf16, #tpu.memory_space<vmem>>, %arg4: memref<7x1x128xf32, #tpu.memory_space<vmem>>, %arg5: memref<128x64xbf16, #tpu.memory_space<vmem>>, %arg6: memref<64x32xbf16, #tpu.memory_space<vmem>>, %arg7: memref<32x16xbf16, #tpu.memory_space<vmem>>, %arg8: memref<1x16xbf16, #tpu.memory_space<vmem>>, %arg9: memref<1x128xf32, #tpu.memory_space<vmem>>, %arg10: memref<1x1x8xf32, #tpu.memory_space<vmem>>) attributes {dimension_semantics = [#tpu.dimension_semantics<parallel>], iteration_bounds = array<i64: 1>, scalar_prefetch = 0 : i64, scratch_operands = 0 : i64, tpu.core_type = #tpu.core_type<tc>, window_params = [{transform_indices = @transform_0, window_bounds = array<i64: 8, 32>}, {pipeline_mode = #tpu.pipeline_mode<synchronous>, transform_indices = @transform_1, window_bounds = array<i64: 32, 128>}, {pipeline_mode = #tpu.pipeline_mode<synchronous>, transform_indices = @transform_2, window_bounds = array<i64: 6, 128, 128>}, {pipeline_mode = #tpu.pipeline_mode<synchronous>, transform_indices = @transform_3, window_bounds = array<i64: 7, 1, 128>}, {pipeline_mode = #tpu.pipeline_mode<synchronous>, transform_indices = @transform_4, window_bounds = array<i64: 128, 64>}, {pipeline_mode = #tpu.pipeline_mode<synchronous>, transform_indices = @transform_5, window_bounds = array<i64: 64, 32>}, {pipeline_mode = #tpu.pipeline_mode<synchronous>, transform_indices = @transform_6, window_bounds = array<i64: 32, 16>}, {pipeline_mode = #tpu.pipeline_mode<synchronous>, transform_indices = @transform_7, window_bounds = array<i64: 1, 16>}, {pipeline_mode = #tpu.pipeline_mode<synchronous>, transform_indices = @transform_8, window_bounds = array<i64: 1, 128>}, {transform_indices = @transform_9, window_bounds = array<i64: 1, 1, 8>}]} {
    %c0 = arith.constant 0 : index
    %c0_0 = arith.constant 0 : index
    %0 = vector.load %arg1[%c0, %c0_0] : memref<8x32xbf16, #tpu.memory_space<vmem>>, vector<8x32xbf16>
    %c0_1 = arith.constant 0 : index
    %c0_2 = arith.constant 0 : index
    %1 = vector.load %arg2[%c0_1, %c0_2] : memref<32x128xbf16, #tpu.memory_space<vmem>>, vector<32x128xbf16>
    %cst = arith.constant dense<0.000000e+00> : vector<8x128xf32>
    %2 = tpu.matmul %0, %1, %cst {dimension_numbers = #tpu.dot_dimension_numbers<[1], [0], [0], [1], [0, 0, 1, 1], [], []>} : vector<8x32xbf16>, vector<32x128xbf16>, vector<8x128xf32> -> vector<8x128xf32>
    %c0_3 = arith.constant 0 : index
    %c0_4 = arith.constant 0 : index
    %c0_5 = arith.constant 0 : index
    %3 = vector.load %arg4[%c0_3, %c0_4, %c0_5] : memref<7x1x128xf32, #tpu.memory_space<vmem>>, vector<1x1x128xf32>
    %4 = vector.shape_cast %3 : vector<1x1x128xf32> to vector<1x128xf32>
    %5 = vector.broadcast %4 : vector<1x128xf32> to vector<8x128xf32>
    %6 = arith.addf %2, %5 : vector<8x128xf32>
    %cst_6 = arith.constant 0.000000e+00 : f32
    %7 = vector.broadcast %cst_6 : f32 to vector<8x128xf32>
    %8 = arith.maximumf %6, %7 : vector<8x128xf32>
    %9 = arith.truncf %8 : vector<8x128xf32> to vector<8x128xbf16>
    %c0_7 = arith.constant 0 : index
    %c0_8 = arith.constant 0 : index
    %c0_9 = arith.constant 0 : index
    %10 = vector.load %arg3[%c0_7, %c0_8, %c0_9] : memref<6x128x128xbf16, #tpu.memory_space<vmem>>, vector<1x128x128xbf16>
    %11 = vector.shape_cast %10 : vector<1x128x128xbf16> to vector<128x128xbf16>
    %cst_10 = arith.constant dense<0.000000e+00> : vector<8x128xf32>
    %12 = tpu.matmul %9, %11, %cst_10 {dimension_numbers = #tpu.dot_dimension_numbers<[1], [0], [0], [1], [0, 0, 1, 1], [], []>} : vector<8x128xbf16>, vector<128x128xbf16>, vector<8x128xf32> -> vector<8x128xf32>
    %c1 = arith.constant 1 : index
    %c0_11 = arith.constant 0 : index
    %c0_12 = arith.constant 0 : index
    %13 = vector.load %arg4[%c1, %c0_11, %c0_12] : memref<7x1x128xf32, #tpu.memory_space<vmem>>, vector<1x1x128xf32>
    %14 = vector.shape_cast %13 : vector<1x1x128xf32> to vector<1x128xf32>
    %15 = vector.broadcast %14 : vector<1x128xf32> to vector<8x128xf32>
    %16 = arith.addf %12, %15 : vector<8x128xf32>
    %cst_13 = arith.constant 0.000000e+00 : f32
    %17 = vector.broadcast %cst_13 : f32 to vector<8x128xf32>
    %18 = arith.maximumf %16, %17 : vector<8x128xf32>
    %19 = arith.truncf %18 : vector<8x128xf32> to vector<8x128xbf16>
    %c1_14 = arith.constant 1 : index
    %c0_15 = arith.constant 0 : index
    %c0_16 = arith.constant 0 : index
    %20 = vector.load %arg3[%c1_14, %c0_15, %c0_16] : memref<6x128x128xbf16, #tpu.memory_space<vmem>>, vector<1x128x128xbf16>
    %21 = vector.shape_cast %20 : vector<1x128x128xbf16> to vector<128x128xbf16>
    %cst_17 = arith.constant dense<0.000000e+00> : vector<8x128xf32>
    %22 = tpu.matmul %19, %21, %cst_17 {dimension_numbers = #tpu.dot_dimension_numbers<[1], [0], [0], [1], [0, 0, 1, 1], [], []>} : vector<8x128xbf16>, vector<128x128xbf16>, vector<8x128xf32> -> vector<8x128xf32>
    %c2 = arith.constant 2 : index
    %c0_18 = arith.constant 0 : index
    %c0_19 = arith.constant 0 : index
    %23 = vector.load %arg4[%c2, %c0_18, %c0_19] : memref<7x1x128xf32, #tpu.memory_space<vmem>>, vector<1x1x128xf32>
    %24 = vector.shape_cast %23 : vector<1x1x128xf32> to vector<1x128xf32>
    %25 = vector.broadcast %24 : vector<1x128xf32> to vector<8x128xf32>
    %26 = arith.addf %22, %25 : vector<8x128xf32>
    %27 = arith.extf %9 : vector<8x128xbf16> to vector<8x128xf32>
    %28 = arith.addf %27, %26 : vector<8x128xf32>
    %cst_20 = arith.constant 0.000000e+00 : f32
    %29 = vector.broadcast %cst_20 : f32 to vector<8x128xf32>
    %30 = arith.maximumf %28, %29 : vector<8x128xf32>
    %31 = arith.truncf %30 : vector<8x128xf32> to vector<8x128xbf16>
    %c2_21 = arith.constant 2 : index
    %c0_22 = arith.constant 0 : index
    %c0_23 = arith.constant 0 : index
    %32 = vector.load %arg3[%c2_21, %c0_22, %c0_23] : memref<6x128x128xbf16, #tpu.memory_space<vmem>>, vector<1x128x128xbf16>
    %33 = vector.shape_cast %32 : vector<1x128x128xbf16> to vector<128x128xbf16>
    %cst_24 = arith.constant dense<0.000000e+00> : vector<8x128xf32>
    %34 = tpu.matmul %31, %33, %cst_24 {dimension_numbers = #tpu.dot_dimension_numbers<[1], [0], [0], [1], [0, 0, 1, 1], [], []>} : vector<8x128xbf16>, vector<128x128xbf16>, vector<8x128xf32> -> vector<8x128xf32>
    %c3 = arith.constant 3 : index
    %c0_25 = arith.constant 0 : index
    %c0_26 = arith.constant 0 : index
    %35 = vector.load %arg4[%c3, %c0_25, %c0_26] : memref<7x1x128xf32, #tpu.memory_space<vmem>>, vector<1x1x128xf32>
    %36 = vector.shape_cast %35 : vector<1x1x128xf32> to vector<1x128xf32>
    %37 = vector.broadcast %36 : vector<1x128xf32> to vector<8x128xf32>
    %38 = arith.addf %34, %37 : vector<8x128xf32>
    %cst_27 = arith.constant 0.000000e+00 : f32
    %39 = vector.broadcast %cst_27 : f32 to vector<8x128xf32>
    %40 = arith.maximumf %38, %39 : vector<8x128xf32>
    %41 = arith.truncf %40 : vector<8x128xf32> to vector<8x128xbf16>
    %c3_28 = arith.constant 3 : index
    %c0_29 = arith.constant 0 : index
    %c0_30 = arith.constant 0 : index
    %42 = vector.load %arg3[%c3_28, %c0_29, %c0_30] : memref<6x128x128xbf16, #tpu.memory_space<vmem>>, vector<1x128x128xbf16>
    %43 = vector.shape_cast %42 : vector<1x128x128xbf16> to vector<128x128xbf16>
    %cst_31 = arith.constant dense<0.000000e+00> : vector<8x128xf32>
    %44 = tpu.matmul %41, %43, %cst_31 {dimension_numbers = #tpu.dot_dimension_numbers<[1], [0], [0], [1], [0, 0, 1, 1], [], []>} : vector<8x128xbf16>, vector<128x128xbf16>, vector<8x128xf32> -> vector<8x128xf32>
    %c4 = arith.constant 4 : index
    %c0_32 = arith.constant 0 : index
    %c0_33 = arith.constant 0 : index
    %45 = vector.load %arg4[%c4, %c0_32, %c0_33] : memref<7x1x128xf32, #tpu.memory_space<vmem>>, vector<1x1x128xf32>
    %46 = vector.shape_cast %45 : vector<1x1x128xf32> to vector<1x128xf32>
    %47 = vector.broadcast %46 : vector<1x128xf32> to vector<8x128xf32>
    %48 = arith.addf %44, %47 : vector<8x128xf32>
    %49 = arith.extf %31 : vector<8x128xbf16> to vector<8x128xf32>
    %50 = arith.addf %49, %48 : vector<8x128xf32>
    %cst_34 = arith.constant 0.000000e+00 : f32
    %51 = vector.broadcast %cst_34 : f32 to vector<8x128xf32>
    %52 = arith.maximumf %50, %51 : vector<8x128xf32>
    %53 = arith.truncf %52 : vector<8x128xf32> to vector<8x128xbf16>
    %c4_35 = arith.constant 4 : index
    %c0_36 = arith.constant 0 : index
    %c0_37 = arith.constant 0 : index
    %54 = vector.load %arg3[%c4_35, %c0_36, %c0_37] : memref<6x128x128xbf16, #tpu.memory_space<vmem>>, vector<1x128x128xbf16>
    %55 = vector.shape_cast %54 : vector<1x128x128xbf16> to vector<128x128xbf16>
    %cst_38 = arith.constant dense<0.000000e+00> : vector<8x128xf32>
    %56 = tpu.matmul %53, %55, %cst_38 {dimension_numbers = #tpu.dot_dimension_numbers<[1], [0], [0], [1], [0, 0, 1, 1], [], []>} : vector<8x128xbf16>, vector<128x128xbf16>, vector<8x128xf32> -> vector<8x128xf32>
    %c5 = arith.constant 5 : index
    %c0_39 = arith.constant 0 : index
    %c0_40 = arith.constant 0 : index
    %57 = vector.load %arg4[%c5, %c0_39, %c0_40] : memref<7x1x128xf32, #tpu.memory_space<vmem>>, vector<1x1x128xf32>
    %58 = vector.shape_cast %57 : vector<1x1x128xf32> to vector<1x128xf32>
    %59 = vector.broadcast %58 : vector<1x128xf32> to vector<8x128xf32>
    %60 = arith.addf %56, %59 : vector<8x128xf32>
    %cst_41 = arith.constant 0.000000e+00 : f32
    %61 = vector.broadcast %cst_41 : f32 to vector<8x128xf32>
    %62 = arith.maximumf %60, %61 : vector<8x128xf32>
    %63 = arith.truncf %62 : vector<8x128xf32> to vector<8x128xbf16>
    %c5_42 = arith.constant 5 : index
    %c0_43 = arith.constant 0 : index
    %c0_44 = arith.constant 0 : index
    %64 = vector.load %arg3[%c5_42, %c0_43, %c0_44] : memref<6x128x128xbf16, #tpu.memory_space<vmem>>, vector<1x128x128xbf16>
    %65 = vector.shape_cast %64 : vector<1x128x128xbf16> to vector<128x128xbf16>
    %cst_45 = arith.constant dense<0.000000e+00> : vector<8x128xf32>
    %66 = tpu.matmul %63, %65, %cst_45 {dimension_numbers = #tpu.dot_dimension_numbers<[1], [0], [0], [1], [0, 0, 1, 1], [], []>} : vector<8x128xbf16>, vector<128x128xbf16>, vector<8x128xf32> -> vector<8x128xf32>
    %c6 = arith.constant 6 : index
    %c0_46 = arith.constant 0 : index
    %c0_47 = arith.constant 0 : index
    %67 = vector.load %arg4[%c6, %c0_46, %c0_47] : memref<7x1x128xf32, #tpu.memory_space<vmem>>, vector<1x1x128xf32>
    %68 = vector.shape_cast %67 : vector<1x1x128xf32> to vector<1x128xf32>
    %69 = vector.broadcast %68 : vector<1x128xf32> to vector<8x128xf32>
    %70 = arith.addf %66, %69 : vector<8x128xf32>
    %71 = arith.extf %53 : vector<8x128xbf16> to vector<8x128xf32>
    %72 = arith.addf %71, %70 : vector<8x128xf32>
    %cst_48 = arith.constant 0.000000e+00 : f32
    %73 = vector.broadcast %cst_48 : f32 to vector<8x128xf32>
    %74 = arith.maximumf %72, %73 : vector<8x128xf32>
    %75 = arith.truncf %74 : vector<8x128xf32> to vector<8x128xbf16>
    %c0_49 = arith.constant 0 : index
    %c0_50 = arith.constant 0 : index
    %76 = vector.load %arg5[%c0_49, %c0_50] : memref<128x64xbf16, #tpu.memory_space<vmem>>, vector<128x64xbf16>
    %cst_51 = arith.constant dense<0.000000e+00> : vector<8x64xf32>
    %77 = tpu.matmul %75, %76, %cst_51 {dimension_numbers = #tpu.dot_dimension_numbers<[1], [0], [0], [1], [0, 0, 1, 1], [], []>} : vector<8x128xbf16>, vector<128x64xbf16>, vector<8x64xf32> -> vector<8x64xf32>
    %c0_52 = arith.constant 0 : index
    %c0_53 = arith.constant 0 : index
    %78 = vector.load %arg9[%c0_52, %c0_53] : memref<1x128xf32, #tpu.memory_space<vmem>>, vector<1x64xf32>
    %79 = vector.broadcast %78 : vector<1x64xf32> to vector<8x64xf32>
    %80 = arith.addf %77, %79 : vector<8x64xf32>
    %cst_54 = arith.constant 0.000000e+00 : f32
    %81 = vector.broadcast %cst_54 : f32 to vector<8x64xf32>
    %82 = arith.maximumf %80, %81 : vector<8x64xf32>
    %83 = arith.truncf %82 : vector<8x64xf32> to vector<8x64xbf16>
    %c0_55 = arith.constant 0 : index
    %c0_56 = arith.constant 0 : index
    %84 = vector.load %arg6[%c0_55, %c0_56] : memref<64x32xbf16, #tpu.memory_space<vmem>>, vector<64x32xbf16>
    %cst_57 = arith.constant dense<0.000000e+00> : vector<8x32xf32>
    %85 = tpu.matmul %83, %84, %cst_57 {dimension_numbers = #tpu.dot_dimension_numbers<[1], [0], [0], [1], [0, 0, 1, 1], [], []>} : vector<8x64xbf16>, vector<64x32xbf16>, vector<8x32xf32> -> vector<8x32xf32>
    %c0_58 = arith.constant 0 : index
    %c64 = arith.constant 64 : index
    %86 = vector.load %arg9[%c0_58, %c64] : memref<1x128xf32, #tpu.memory_space<vmem>>, vector<1x32xf32>
    %87 = vector.broadcast %86 : vector<1x32xf32> to vector<8x32xf32>
    %88 = arith.addf %85, %87 : vector<8x32xf32>
    %cst_59 = arith.constant 0.000000e+00 : f32
    %89 = vector.broadcast %cst_59 : f32 to vector<8x32xf32>
    %90 = arith.maximumf %88, %89 : vector<8x32xf32>
    %91 = arith.truncf %90 : vector<8x32xf32> to vector<8x32xbf16>
    %c0_60 = arith.constant 0 : index
    %c0_61 = arith.constant 0 : index
    %92 = vector.load %arg7[%c0_60, %c0_61] : memref<32x16xbf16, #tpu.memory_space<vmem>>, vector<32x16xbf16>
    %cst_62 = arith.constant dense<0.000000e+00> : vector<8x16xf32>
    %93 = tpu.matmul %91, %92, %cst_62 {dimension_numbers = #tpu.dot_dimension_numbers<[1], [0], [0], [1], [0, 0, 1, 1], [], []>} : vector<8x32xbf16>, vector<32x16xbf16>, vector<8x16xf32> -> vector<8x16xf32>
    %c0_63 = arith.constant 0 : index
    %c96 = arith.constant 96 : index
    %94 = vector.load %arg9[%c0_63, %c96] : memref<1x128xf32, #tpu.memory_space<vmem>>, vector<1x16xf32>
    %95 = vector.broadcast %94 : vector<1x16xf32> to vector<8x16xf32>
    %96 = arith.addf %93, %95 : vector<8x16xf32>
    %cst_64 = arith.constant 0.000000e+00 : f32
    %97 = vector.broadcast %cst_64 : f32 to vector<8x16xf32>
    %98 = arith.maximumf %96, %97 : vector<8x16xf32>
    %99 = arith.truncf %98 : vector<8x16xf32> to vector<8x16xbf16>
    %c0_65 = arith.constant 0 : index
    %c0_66 = arith.constant 0 : index
    %100 = vector.load %arg8[%c0_65, %c0_66] : memref<1x16xbf16, #tpu.memory_space<vmem>>, vector<1x16xbf16>
    %cst_67 = arith.constant dense<0.000000e+00> : vector<1x8xf32>
    %101 = tpu.matmul %100, %99, %cst_67 {dimension_numbers = #tpu.dot_dimension_numbers<[1], [1], [0], [0], [0, 0, 1, 0], [], []>} : vector<1x16xbf16>, vector<8x16xbf16>, vector<1x8xf32> -> vector<1x8xf32>
    %c0_68 = arith.constant 0 : index
    %c112 = arith.constant 112 : index
    %102 = vector.load %arg9[%c0_68, %c112] : memref<1x128xf32, #tpu.memory_space<vmem>>, vector<1x1xf32>
    %103 = vector.broadcast %102 : vector<1x1xf32> to vector<1x8xf32>
    %104 = arith.addf %101, %103 : vector<1x8xf32>
    %c0_69 = arith.constant 0 : index
    %c0_70 = arith.constant 0 : index
    %c0_71 = arith.constant 0 : index
    %105 = vector.load %arg10[%c0_69, %c0_70, %c0_71] : memref<1x1x8xf32, #tpu.memory_space<vmem>>, vector<1x1x8xf32>
    %106 = vector.shape_cast %105 : vector<1x1x8xf32> to vector<1x8xf32>
    %107 = vector.shape_cast %104 : vector<1x8xf32> to vector<1x1x8xf32>
    tpu.vector_store %arg10[%c0_69, %c0_70, %c0_71], %107 {strides = array<i32>} : memref<1x1x8xf32, #tpu.memory_space<vmem>>, vector<1x1x8xf32>,
    return
  }
  func.func @transform_0(%arg0: i32) -> (i32, i32) {
    %c0_i32 = arith.constant 0 : i32
    %c0_i32_0 = arith.constant 0 : i32
    return %arg0, %c0_i32 : i32, i32
  }
  func.func @transform_1(%arg0: i32) -> (i32, i32) {
    %c0_i32 = arith.constant 0 : i32
    %c0_i32_0 = arith.constant 0 : i32
    %c0_i32_1 = arith.constant 0 : i32
    return %c0_i32, %c0_i32_0 : i32, i32
  }
  func.func @transform_2(%arg0: i32) -> (i32, i32, i32) {
    %c0_i32 = arith.constant 0 : i32
    %c0_i32_0 = arith.constant 0 : i32
    %c0_i32_1 = arith.constant 0 : i32
    %c0_i32_2 = arith.constant 0 : i32
    return %c0_i32, %c0_i32_0, %c0_i32_1 : i32, i32, i32
  }
  func.func @transform_3(%arg0: i32) -> (i32, i32, i32) {
    %c0_i32 = arith.constant 0 : i32
    %c0_i32_0 = arith.constant 0 : i32
    %c0_i32_1 = arith.constant 0 : i32
    %c0_i32_2 = arith.constant 0 : i32
    return %c0_i32, %c0_i32_0, %c0_i32_1 : i32, i32, i32
  }
  func.func @transform_4(%arg0: i32) -> (i32, i32) {
    %c0_i32 = arith.constant 0 : i32
    %c0_i32_0 = arith.constant 0 : i32
    %c0_i32_1 = arith.constant 0 : i32
    return %c0_i32, %c0_i32_0 : i32, i32
  }
  func.func @transform_5(%arg0: i32) -> (i32, i32) {
    %c0_i32 = arith.constant 0 : i32
    %c0_i32_0 = arith.constant 0 : i32
    %c0_i32_1 = arith.constant 0 : i32
    return %c0_i32, %c0_i32_0 : i32, i32
  }
  func.func @transform_6(%arg0: i32) -> (i32, i32) {
    %c0_i32 = arith.constant 0 : i32
    %c0_i32_0 = arith.constant 0 : i32
    %c0_i32_1 = arith.constant 0 : i32
    return %c0_i32, %c0_i32_0 : i32, i32
  }
  func.func @transform_7(%arg0: i32) -> (i32, i32) {
    %c0_i32 = arith.constant 0 : i32
    %c0_i32_0 = arith.constant 0 : i32
    %c0_i32_1 = arith.constant 0 : i32
    return %c0_i32, %c0_i32_0 : i32, i32
  }
  func.func @transform_8(%arg0: i32) -> (i32, i32) {
    %c0_i32 = arith.constant 0 : i32
    %c0_i32_0 = arith.constant 0 : i32
    %c0_i32_1 = arith.constant 0 : i32
    return %c0_i32, %c0_i32_0 : i32, i32
  }
  func.func @transform_9(%arg0: i32) -> (i32, i32, i32) {
    %c0_i32 = arith.constant 0 : i32
    %c0_i32_0 = arith.constant 0 : i32
    %c0_i32_1 = arith.constant 0 : i32
    return %arg0, %c0_i32, %c0_i32_0 : i32, i32, i32
  }
}

</mosaic_0001>

<bundles_post_ra>
// kernel: tpu_custom_call.1
= control target key start
LH: loop header
LB: loop body
LE: loop exit
PB: predicated region body
PF: predicated region fallthrough
CT: control target
= control target key end

     0   :  { %14 = vsyncpa [#allocation3], 0  ;;  %s1842_s0 = inlined_call_operand.vmem [shape: bf16[8,32], index: 0, kind: input, shape index: {}]   ;;  %s1843_s1 = inlined_call_operand.vmem [shape: bf16[32,128], index: 1, kind: input, shape index: {}]   ;;  %s1844_s2 = inlined_call_operand.hbm [shape: bf16[6,128,128], index: 2, kind: input, shape index: {}]   ;;  %s1845_s3 = inlined_call_operand.vmem [shape: f32[7,1,128], index: 3, kind: input, shape index: {}]   ;;  %s1846_s4 = inlined_call_operand.vmem [shape: bf16[128,64], index: 4, kind: input, shape index: {}]   ;;  %s1847_s5 = inlined_call_operand.vmem [shape: bf16[64,32], index: 5, kind: input, shape index: {}]   ;;  %s1848_s6 = inlined_call_operand.vmem [shape: bf16[32,16], index: 6, kind: input, shape index: {}]   ;;  %s1849_s7 = inlined_call_operand.vmem [shape: bf16[1,16], index: 7, kind: input, shape index: {}]   ;;  %s1850_s8 = inlined_call_operand.vmem [shape: f32[1,128], index: 8, kind: input, shape index: {}]   ;;  %s1851_s9 = inlined_call_operand.hbm [shape: f32[1,1,8], index: 9, kind: output, shape index: {}]  }
   0x1   :  { %15 = vsyncpa [#allocation4], 0  ;;  %s1593_s30 = smov [#allocation2]  }
   0x2   :  { %s25_s10 = sshll.u32 %s1593_s30, 4  ;;  %s26_s10 = int_to_ptr.vmem [resolvable:$true] %s25_s10 }
   0x3   :  { %s1557_s11 = scalar_lea.vmem %s26_s10, 6144  ;;  %p1562_p1 = scmp.lt.s32.totalorder %s26_s10, %s26_s10 }
   0x4   :  { %p1558_p0 = scmp.ne.s32.totalorder %s26_s10, %s1557_s11  ;;  %p1563_p2 = scmp.lt.s32.totalorder %s1557_s11, %s1557_s11 }
   0x6   :  { %p1564_p3 = por %p1563_p2, %p1562_p1 }
   0x8   :  { %p1565_p4 = pnand %p1564_p3, %p1558_p0 }
   0xa   :  { %1568 = shalt.err (!%p1565_p4)
}
   0xb   :  { %s1594_s12 = smov 64   ;;  %s1595_s13 = smov 4  }
   0xc   :  { %31 = dma.hbm_to_vmem [thread:$0]  %s1844_s2, 6144, %s26_s10, [#allocation3], %s1594_s12, %s1594_s12, %s1595_s13  }
   0xd   :  { %1589 = dma.done.wait [#allocation3], 6144  }
   0xe   :  { %1590 = vsyncadd [#allocation3], 4294961152  ;;  %v1596_v0 = vmov 0.0   ;;  %vm1597_vm0 = vmmov 0   ;;  %v1485_v1 = vld [vmem:[%s1843_s1 + $0x8] sm:$0xff]   ;;  %v1486_v2 = vld [vmem:[%s1843_s1] sm:$0xff]  }
   0xf   :  { %1301 = vmatprep.subr.bf16.mxu0 %v1596_v0  ;;  %1305 = vmatprep.mubr.msk.bf16.mxu0 %vm1597_vm0, %v1596_v0  ;;  %v1487_v3 = vld [vmem:[#allocation2 + $0x38] sm:$0xff]   ;;  %vm72_vm1 = vcmask 261120   ;;  %v1488_v4 = vld [vmem:[#allocation2 + $0x30] sm:$0xff]   ;;  %v48_v5 = vld [vmem:[%s1842_s0] sm:$0xf]  ;;  %vm961_vm2 = vcmask 523264  }
  0x10   :  { %1309 = vmatprep.subr.bf16.mxu1 %v1596_v0  ;;  %1325 = vmatprep.mubr.msk.bf16.mxu1 %vm1597_vm0, %v1596_v0  ;;  %v1489_v6 = vld [vmem:[#allocation2 + $0x28] sm:$0xff]   ;;  %v1490_v7 = vld [vmem:[#allocation2 + $0x20] sm:$0xff]   ;;  %v1491_v8 = vld [vmem:[#allocation2 + $0x18] sm:$0xff]   ;;  %s1598_s15 = smov 32   ;;  %vm1080_vm3 = vcmask 130048   ;;  %s1600_s17 = smov [#allocation5]  }
  0x11   :  { %1302 = vmatpush3.bf16.msra.mxu0 %v1485_v1  ;;  %1310 = vmatpush3.bf16.msra.mxu1 %v1487_v3  ;;  %v1492_v9 = vld [vmem:[#allocation2 + $0x10] sm:$0xff]   ;;  %v1493_v10 = vld [vmem:[#allocation2 + $0x8] sm:$0xff]   ;;  %v1494_v11 = vld [vmem:[#allocation2] sm:$0xff]   ;;  %s1135_s2 = sshll.u32 %s1600_s17, 4  ;;  %vm1127_vm4 = vcmask 57344   ;;  %s1136_s2 = int_to_ptr.vmem [resolvable:$true] %s1135_s2 }
  0x12   :  { %1303 = vmatprep.subr.bf16.mxu0 %v1596_v0  ;;  %1311 = vmatprep.subr.bf16.mxu1 %v1596_v0  ;;  %v1495_v12 = vld [vmem:[#allocation2 + $0x78] sm:$0xff]   ;;  %v1496_v13 = vld [vmem:[#allocation2 + $0x70] sm:$0xff]   ;;  %v1497_v14 = vld [vmem:[#allocation2 + $0x68] sm:$0xff]   ;;  %s1569_s18 = scalar_lea.vmem %s1136_s2, 16  ;;  %s1573_s19 = scalar_lea.vmem %s1136_s2, 32 }
  0x13   :  { %v1498_v15 = vld [vmem:[#allocation2 + $0x60] sm:$0xff]   ;;  %v1499_v16 = vld [vmem:[#allocation2 + $0x58] sm:$0xff]   ;;  %v1500_v17 = vld [vmem:[#allocation2 + $0x50] sm:$0xff]   ;;  %p1570_p5 = scmp.ne.s32.totalorder %s1136_s2, %s1569_s18  ;;  %p1574_p6 = scmp.lt.s32.totalorder %s1136_s2, %s1136_s2 }
  0x14   :  { %v1144_v18 = vld [vmem:[%s1845_s3] ss:$0 sm:$0xff]  ;;  %v1501_v26 = vld [vmem:[#allocation2 + $0x48] sm:$0xff]   ;;  %v1503_v28 = vld [vmem:[#allocation2 + $0xb8] sm:$0xff]   ;;  %p1575_p7 = scmp.lt.s32.totalorder %s1573_s19, %s1569_s18 }
  0x15   :  { %1304 = vmatpush3.bf16.msra.mxu0 %v1486_v2  ;;  %1312 = vmatpush3.bf16.msra.mxu1 %v1488_v4  ;;  %v1502_v27 = vld [vmem:[#allocation2 + $0x40] sm:$0xff]   ;;  %v1504_v29 = vld [vmem:[#allocation2 + $0xb0] sm:$0xff]   ;;  %v1505_v30 = vld [vmem:[#allocation2 + $0xa8] sm:$0xff]  }
  0x16   :  { %1329 = vmatprep.subr.bf16.mxu0 %v1596_v0  ;;  %1313 = vmatprep.subr.bf16.mxu1 %v1596_v0  ;;  %v1506_v31 = vld [vmem:[#allocation2 + $0xa0] sm:$0xff]   ;;  %v1507_v32 = vld [vmem:[#allocation2 + $0x98] sm:$0xff]   ;;  %v1508_v33 = vld [vmem:[#allocation2 + $0x90] sm:$0xff]   ;;  %p1576_p8 = por %p1575_p7, %p1574_p6 }
  0x17   :  { %v1149_v34 = vld [vmem:[%s1845_s3 + $0x1] ss:$0 sm:$0xff]  ;;  %v1509_v42 = vld [vmem:[#allocation2 + $0x88] sm:$0xff]   ;;  %v1511_v44 = vld [vmem:[#allocation2 + $0xf8] sm:$0xff]  }
  0x18   :  { %1306 = vmatmul.mubr.msk.bf16.vlgmr.msra.gmra.mxu0 %vm72_vm1, %v48_v5  ;;  %v1510_v43 = vld [vmem:[#allocation2 + $0x80] sm:$0xff]   ;;  %v1512_v45 = vld [vmem:[#allocation2 + $0xf0] sm:$0xff]   ;;  %v1513_v46 = vld [vmem:[#allocation2 + $0xe8] sm:$0xff]   ;;  %p1577_p9 = pnand %p1576_p8, %p1570_p5 }
  0x19   :  { %1345 = vmatprep.mubr.msk.bf16.mxu0 %vm1597_vm0, %v1596_v0  ;;  %1314 = vmatpush3.bf16.msra.mxu1 %v1489_v6  ;;  %v1514_v47 = vld [vmem:[#allocation2 + $0xe0] sm:$0xff]   ;;  %v1515_v48 = vld [vmem:[#allocation2 + $0xd8] sm:$0xff]   ;;  %v1516_v49 = vld [vmem:[#allocation2 + $0xd0] sm:$0xff]  }
  0x1a   :  { %1315 = vmatprep.subr.bf16.mxu1 %v1596_v0  ;;  %1330 = vmatpush3.bf16.msra.mxu0 %v1495_v12  ;;  %v1159_v50 = vld [vmem:[%s1845_s3 + $0x2] ss:$0 sm:$0xff]  ;;  %v1517_v60 = vld [vmem:[#allocation2 + $0xc8] sm:$0xff]   ;;  %v1519_v62 = vld [vmem:[#allocation2 + $0x138] sm:$0xff]  }
  0x1b   :  { %1331 = vmatprep.subr.bf16.mxu0 %v1596_v0  ;;  %v1518_v61 = vld [vmem:[#allocation2 + $0xc0] sm:$0xff]   ;;  %v1520_v63 = vld [vmem:[#allocation2 + $0x130] sm:$0xff]   ;;  %v1521_v1 = vld [vmem:[#allocation2 + $0x128] sm:$0xff]  }
  0x1c   :  { %v1522_v2 = vld [vmem:[#allocation2 + $0x120] sm:$0xff]   ;;  %v1523_v3 = vld [vmem:[#allocation2 + $0x118] sm:$0xff]   ;;  %v1524_v4 = vld [vmem:[#allocation2 + $0x110] sm:$0xff]  }
  0x1d   :  { %1316 = vmatpush3.bf16.msra.mxu1 %v1490_v7  ;;  %v1169_v5 = vld [vmem:[%s1845_s3 + $0x3] ss:$0 sm:$0xff] }
  0x1e   :  { %1317 = vmatprep.subr.bf16.mxu1 %v1596_v0  ;;  %1332 = vmatpush3.bf16.msra.mxu0 %v1496_v13  ;;  %v1525_v13 = vld [vmem:[#allocation2 + $0x108] sm:$0xff]  }
  0x1f   :  { %1333 = vmatprep.subr.bf16.mxu0 %v1596_v0 }
  0x21   :  { %1318 = vmatpush3.bf16.msra.mxu1 %v1491_v8 }
  0x22   :  { %1319 = vmatprep.subr.bf16.mxu1 %v1596_v0  ;;  %1334 = vmatpush3.bf16.msra.mxu0 %v1497_v14  ;;  %v1526_v14 = vld [vmem:[#allocation2 + $0x100] sm:$0xff]  }
  0x23   :  { %1335 = vmatprep.subr.bf16.mxu0 %v1596_v0 }
  0x25   :  { %1320 = vmatpush3.bf16.msra.mxu1 %v1492_v9 }
  0x26   :  { %1321 = vmatprep.subr.bf16.mxu1 %v1596_v0  ;;  %1336 = vmatpush3.bf16.msra.mxu0 %v1498_v15  ;;  %v1527_v15 = vld [vmem:[#allocation2 + $0x178] sm:$0xff]  }
  0x27   :  { %1337 = vmatprep.subr.bf16.mxu0 %v1596_v0 }
  0x29   :  { %1322 = vmatpush3.bf16.msra.mxu1 %v1493_v10 }
  0x2a   :  { %1323 = vmatprep.subr.bf16.mxu1 %v1596_v0  ;;  %1338 = vmatpush3.bf16.msra.mxu0 %v1499_v16  ;;  %v1528_v16 = vld [vmem:[#allocation2 + $0x170] sm:$0xff]  }
  0x2b   :  { %1339 = vmatprep.subr.bf16.mxu0 %v1596_v0 }
  0x2d   :  { %1324 = vmatpush3.bf16.msra.mxu1 %v1494_v11 }
  0x2e   :  { %1349 = vmatprep.subr.bf16.mxu1 %v1596_v0  ;;  %1340 = vmatpush3.bf16.msra.mxu0 %v1500_v17  ;;  %v1529_v17 = vld [vmem:[#allocation2 + $0x168] sm:$0xff]  }
  0x2f   :  { %1341 = vmatprep.subr.bf16.mxu0 %v1596_v0 }
  0x32   :  { %1342 = vmatpush3.bf16.msra.mxu0 %v1501_v26 }
  0x33   :  { %1343 = vmatprep.subr.bf16.mxu0 %v1596_v0 }
  0x36   :  { %1344 = vmatpush3.bf16.msra.mxu0 %v1502_v27 }
  0x37   :  { %1369 = vmatprep.subr.bf16.mxu0 %v1596_v0 }
  0xd8   :  { %v110_v19 = vpop.f32.mrf.mxu0 }
  0xd9   :  { %v111_v20 = vadd.f32 %v1144_v18, %v110_v19  ;;  %v1530_v18 = vld [vmem:[#allocation2 + $0x160] sm:$0xff]   ;;  %v1531_v19 = vld [vmem:[#allocation2 + $0x158] sm:$0xff]  }
  0xda   :  { %v1307_v21 = vpop.f32.mrf.mxu0 }
  0xdb   :  { %v116_v22 = vmax.f32 %v111_v20, 0.0  ;;  %v1532_v20 = vld [vmem:[#allocation2 + $0x150] sm:$0xff]   ;;  %v1179_v21 = vld [vmem:[%s1845_s3 + $0x4] ss:$0 sm:$0xff] }
  0xdc   :  { %v113_v23 = vpop.f32.mrf.mxu0 }
  0xdd   :  { %v1693_v24 = vpack.c.bf16 %v116_v22, %v116_v22 }
  0xde   :  { %v1308_v25 = vpop.f32.mrf.mxu0 }
  0xdf   :  { %1326 = vmatmul.mubr.bf16.vlgmr.msra.gmra.mxu1 %v1693_v24  ;;  %v345_v52 = vunpack.c.l.bf16 %v1693_v24 }
  0xe0   :  { %1365 = vmatprep.mubr.msk.bf16.mxu1 %vm1597_vm0, %v1596_v0  ;;  %1350 = vmatpush3.bf16.msra.mxu1 %v1503_v28 }
  0xe1   :  { %1351 = vmatprep.subr.bf16.mxu1 %v1596_v0 }
  0xe4   :  { %1352 = vmatpush3.bf16.msra.mxu1 %v1504_v29 }
  0xe5   :  { %1353 = vmatprep.subr.bf16.mxu1 %v1596_v0 }
  0xe8   :  { %1354 = vmatpush3.bf16.msra.mxu1 %v1505_v30 }
  0xe9   :  { %1355 = vmatprep.subr.bf16.mxu1 %v1596_v0 }
  0xec   :  { %1356 = vmatpush3.bf16.msra.mxu1 %v1506_v31  ;;  %v1533_v31 = vld [vmem:[#allocation2 + $0x148] sm:$0xff]  }
  0xed   :  { %1357 = vmatprep.subr.bf16.mxu1 %v1596_v0 }
  0xf0   :  { %1358 = vmatpush3.bf16.msra.mxu1 %v1507_v32  ;;  %v1534_v32 = vld [vmem:[#allocation2 + $0x140] sm:$0xff]  }
  0xf1   :  { %1359 = vmatprep.subr.bf16.mxu1 %v1596_v0 }
  0xf4   :  { %1360 = vmatpush3.bf16.msra.mxu1 %v1508_v33  ;;  %v1535_v33 = vld [vmem:[%s1846_s4 + $0x38] sm:$0xff]  }
  0xf5   :  { %1361 = vmatprep.subr.bf16.mxu1 %v1596_v0 }
  0xf8   :  { %1362 = vmatpush3.bf16.msra.mxu1 %v1509_v42 }
  0xf9   :  { %1363 = vmatprep.subr.bf16.mxu1 %v1596_v0 }
  0xfc   :  { %1364 = vmatpush3.bf16.msra.mxu1 %v1510_v43 }
  0xfd   :  { %1389 = vmatprep.subr.bf16.mxu1 %v1596_v0 }
 0x19f   :  { %v224_v35 = vpop.f32.mrf.mxu1 }
 0x1a0   :  { %v225_v36 = vadd.f32 %v1149_v34, %v224_v35  ;;  %v1536_v34 = vld [vmem:[%s1846_s4 + $0x30] sm:$0xff]   ;;  %v1537_v35 = vld [vmem:[%s1846_s4 + $0x28] sm:$0xff]  }
 0x1a1   :  { %v1327_v37 = vpop.f32.mrf.mxu1 }
 0x1a2   :  { %v230_v38 = vmax.f32 %v225_v36, 0.0  ;;  %v1538_v36 = vld [vmem:[%s1846_s4 + $0x20] sm:$0xff]   ;;  %v1539_v37 = vld [vmem:[%s1846_s4 + $0x18] sm:$0xff]  }
 0x1a3   :  { %v227_v39 = vpop.f32.mrf.mxu1 }
 0x1a4   :  { %v231_v40 = vpack.c.bf16 %v230_v38, %v230_v38  ;;  %v1540_v38 = vld [vmem:[%s1846_s4 + $0x10] sm:$0xff]   ;;  %v1189_v39 = vld [vmem:[%s1845_s3 + $0x5] ss:$0 sm:$0xff] }
 0x1a5   :  { %v1328_v41 = vpop.f32.mrf.mxu1 }
 0x1a6   :  { %1346 = vmatmul.mubr.bf16.vlgmr.msra.gmra.mxu0 %v231_v40 }
 0x1a7   :  { %1385 = vmatprep.mubr.msk.bf16.mxu0 %vm1597_vm0, %v1596_v0  ;;  %1370 = vmatpush3.bf16.msra.mxu0 %v1511_v44 }
 0x1a8   :  { %1371 = vmatprep.subr.bf16.mxu0 %v1596_v0 }
 0x1ab   :  { %1372 = vmatpush3.bf16.msra.mxu0 %v1512_v45 }
 0x1ac   :  { %1373 = vmatprep.subr.bf16.mxu0 %v1596_v0 }
 0x1af   :  { %1374 = vmatpush3.bf16.msra.mxu0 %v1513_v46 }
 0x1b0   :  { %1375 = vmatprep.subr.bf16.mxu0 %v1596_v0 }
 0x1b3   :  { %1376 = vmatpush3.bf16.msra.mxu0 %v1514_v47  ;;  %v1541_v47 = vld [vmem:[%s1846_s4 + $0x8] sm:$0xff]  }
 0x1b4   :  { %1377 = vmatprep.subr.bf16.mxu0 %v1596_v0 }
 0x1b7   :  { %1378 = vmatpush3.bf16.msra.mxu0 %v1515_v48  ;;  %v1542_v48 = vld [vmem:[%s1846_s4] sm:$0xff]  }
 0x1b8   :  { %1379 = vmatprep.subr.bf16.mxu0 %v1596_v0 }
 0x1bb   :  { %1380 = vmatpush3.bf16.msra.mxu0 %v1516_v49  ;;  %v1543_v49 = vld [vmem:[%s1847_s5 + $0x18] sm:$0xff]  }
 0x1bc   :  { %1381 = vmatprep.subr.bf16.mxu0 %v1596_v0 }
 0x1bf   :  { %1382 = vmatpush3.bf16.msra.mxu0 %v1517_v60 }
 0x1c0   :  { %1383 = vmatprep.subr.bf16.mxu0 %v1596_v0 }
 0x1c3   :  { %1384 = vmatpush3.bf16.msra.mxu0 %v1518_v61 }
 0x1c4   :  { %1409 = vmatprep.subr.bf16.mxu0 %v1596_v0 }
 0x266   :  { %v339_v51 = vpop.f32.mrf.mxu0 }
 0x267   :  { %v340_v53 = vadd.f32 %v1159_v50, %v339_v51  ;;  %v831_v50 = vlaneseq  ;;  %v1544_v51 = vld [vmem:[%s1847_s5 + $0x10] sm:$0xff]  }
 0x268   :  { %v1347_v54 = vpop.f32.mrf.mxu0 }
 0x269   :  { %v346_v55 = vadd.f32 %v345_v52, %v340_v53  ;;  %v1799_v52 = vshrl.u32 %v831_v50, 7  ;;  %v829_v53 = vld [vmem:[%s1850_s8] sm:$0x1] }
 0x26a   :  { %v342_v56 = vpop.f32.mrf.mxu0 }
 0x26b   :  { %v347_v57 = vmax.f32 %v346_v55, 0.0  ;;  %v833_v54 = vsub.s32 0, %v1799_v52  ;;  %v1199_v56 = vld [vmem:[%s1845_s3 + $0x6] ss:$0 sm:$0xff] }
 0x26c   :  { %v1348_v58 = vpop.f32.mrf.mxu0 }
 0x26d   :  { %v1723_v59 = vpack.c.bf16 %v347_v57, %v347_v57  ;;  %v834_v55 = vrot.slane %v829_v53, %v833_v54 }
 0x26f   :  { %1366 = vmatmul.mubr.bf16.vlgmr.msra.gmra.mxu1 %v1723_v59  ;;  %v577_v24 = vunpack.c.l.bf16 %v1723_v59  ;;  %958 = vrot.lane.b32.xlu0 %v834_v55, %s1594_s12 }
 0x270   :  { %1405 = vmatprep.mubr.msk.bf16.mxu1 %vm1597_vm0, %v1596_v0  ;;  %1390 = vmatpush3.bf16.msra.mxu1 %v1519_v62 }
 0x271   :  { %1391 = vmatprep.subr.bf16.mxu1 %v1596_v0 }
 0x273   :  { %1023 = vrot.lane.b32.xlu0 %v834_v55, %s1598_s15 }
 0x274   :  { %1392 = vmatpush3.bf16.msra.mxu1 %v1520_v63 }
 0x275   :  { %1393 = vmatprep.subr.bf16.mxu1 %v1596_v0 }
 0x278   :  { %1394 = vmatpush3.bf16.msra.mxu1 %v1521_v1 }
 0x279   :  { %1395 = vmatprep.subr.bf16.mxu1 %v1596_v0 }
 0x27c   :  { %1396 = vmatpush3.bf16.msra.mxu1 %v1522_v2 }
 0x27d   :  { %1397 = vmatprep.subr.bf16.mxu1 %v1596_v0 }
 0x280   :  { %1398 = vmatpush3.bf16.msra.mxu1 %v1523_v3  ;;  %v1545_v3 = vld [vmem:[%s1847_s5 + $0x8] sm:$0xff]  }
 0x281   :  { %1399 = vmatprep.subr.bf16.mxu1 %v1596_v0 }
 0x284   :  { %1400 = vmatpush3.bf16.msra.mxu1 %v1524_v4  ;;  %v1546_v4 = vld [vmem:[%s1847_s5] sm:$0xff]  }
 0x285   :  { %1401 = vmatprep.subr.bf16.mxu1 %v1596_v0 }
 0x288   :  { %1402 = vmatpush3.bf16.msra.mxu1 %v1525_v13  ;;  %v1548_v13 = vld [vmem:[%s1848_s6] sm:$0xff]  }
 0x289   :  { %1403 = vmatprep.subr.bf16.mxu1 %v1596_v0 }
 0x28c   :  { %1404 = vmatpush3.bf16.msra.mxu1 %v1526_v14 }
 0x28d   :  { %1429 = vmatprep.subr.bf16.mxu1 %v1596_v0 }
 0x2e1   :  { %v959_v14 = vpop.permute.xlu0 %958 }
 0x32f   :  { %v456_v6 = vpop.f32.mrf.mxu1 }
 0x330   :  { %v457_v7 = vadd.f32 %v1169_v5, %v456_v6 }
 0x331   :  { %v1367_v8 = vpop.f32.mrf.mxu1 }
 0x332   :  { %v462_v9 = vmax.f32 %v457_v7, 0.0 }
 0x333   :  { %v459_v10 = vpop.f32.mrf.mxu1 }
 0x334   :  { %v463_v11 = vpack.c.bf16 %v462_v9, %v462_v9 }
 0x335   :  { %v1368_v12 = vpop.f32.mrf.mxu1 }
 0x336   :  { %1386 = vmatmul.mubr.bf16.vlgmr.msra.gmra.mxu0 %v463_v11  ;;  %v1547_v12 = vld [vmem:[%s1848_s6 + $0x8] sm:$0xff]  }
 0x337   :  { %1425 = vmatprep.mubr.msk.bf16.mxu0 %vm1597_vm0, %v1596_v0  ;;  %1410 = vmatpush3.bf16.msra.mxu0 %v1527_v15 }
 0x338   :  { %1411 = vmatprep.subr.bf16.mxu0 %v1596_v0 }
 0x33b   :  { %1412 = vmatpush3.bf16.msra.mxu0 %v1528_v16 }
 0x33c   :  { %1413 = vmatprep.subr.bf16.mxu0 %v1596_v0 }
 0x33f   :  { %1414 = vmatpush3.bf16.msra.mxu0 %v1529_v17 }
 0x340   :  { %1415 = vmatprep.subr.bf16.mxu0 %v1596_v0 }
 0x343   :  { %1416 = vmatpush3.bf16.msra.mxu0 %v1530_v18 }
 0x344   :  { %1417 = vmatprep.subr.bf16.mxu0 %v1596_v0 }
 0x347   :  { %1418 = vmatpush3.bf16.msra.mxu0 %v1531_v19 }
 0x348   :  { %1419 = vmatprep.subr.bf16.mxu0 %v1596_v0 }
 0x34b   :  { %1420 = vmatpush3.bf16.msra.mxu0 %v1532_v20 }
 0x34c   :  { %1421 = vmatprep.subr.bf16.mxu0 %v1596_v0 }
 0x34f   :  { %1422 = vmatpush3.bf16.msra.mxu0 %v1533_v31 }
 0x350   :  { %1423 = vmatprep.subr.bf16.mxu0 %v1596_v0 }
 0x353   :  { %1424 = vmatpush3.bf16.msra.mxu0 %v1534_v32  ;;  %v1071_v32 = vld [vmem:[%s1849_s7] sm:$0x1] }
 0x354   :  { %1449 = vmatprep.subr.bf16.mxu0 %v1596_v0 }
 0x3f6   :  { %v571_v22 = vpop.f32.mrf.mxu0 }
 0x3f7   :  { %v572_v23 = vadd.f32 %v1179_v21, %v571_v22  ;;  %v1599_v22 = vmov 112  }
 0x3f8   :  { %v1387_v25 = vpop.f32.mrf.mxu0  ;;  %1483 = vset.pattern.permute.xlu1 %v1599_v22  ;;  %1484 = vset.pattern.permute.xlu0 %v1599_v22 }
 0x3f9   :  { %v578_v26 = vadd.f32 %v577_v24, %v572_v23  ;;  %1073 = vperm.xlu1 %1483, %v829_v53   ;;  %v1024_v23 = vpop.permute.xlu0 %1023 }
 0x3fa   :  { %v574_v27 = vpop.f32.mrf.mxu0 }
 0x3fb   :  { %v579_v28 = vmax.f32 %v578_v26, 0.0 }
 0x3fc   :  { %v1388_v29 = vpop.f32.mrf.mxu0 }
 0x3fd   :  { %v580_v30 = vpack.c.bf16 %v579_v28, %v579_v28 }
 0x3ff   :  { %1406 = vmatmul.mubr.bf16.vlgmr.msra.gmra.mxu1 %v580_v30  ;;  %v809_v59 = vunpack.c.l.bf16 %v580_v30 }
 0x400   :  { %1445 = vmatprep.mubr.msk.bf16.mxu1 %vm1597_vm0, %v1596_v0  ;;  %1430 = vmatpush3.bf16.msra.mxu1 %v1535_v33 }
 0x401   :  { %1431 = vmatprep.subr.bf16.mxu1 %v1596_v0 }
 0x404   :  { %1432 = vmatpush3.bf16.msra.mxu1 %v1536_v34 }
 0x405   :  { %1433 = vmatprep.subr.bf16.mxu1 %v1596_v0 }
 0x408   :  { %1434 = vmatpush3.bf16.msra.mxu1 %v1537_v35 }
 0x409   :  { %1435 = vmatprep.subr.bf16.mxu1 %v1596_v0 }
 0x40c   :  { %1436 = vmatpush3.bf16.msra.mxu1 %v1538_v36 }
 0x40d   :  { %1437 = vmatprep.subr.bf16.mxu1 %v1596_v0 }
 0x410   :  { %1438 = vmatpush3.bf16.msra.mxu1 %v1539_v37 }
 0x411   :  { %1439 = vmatprep.subr.bf16.mxu1 %v1596_v0 }
 0x414   :  { %1440 = vmatpush3.bf16.msra.mxu1 %v1540_v38 }
 0x415   :  { %1441 = vmatprep.subr.bf16.mxu1 %v1596_v0 }
 0x418   :  { %1442 = vmatpush3.bf16.msra.mxu1 %v1541_v47 }
 0x419   :  { %1443 = vmatprep.subr.bf16.mxu1 %v1596_v0 }
 0x41c   :  { %1444 = vmatpush3.bf16.msra.mxu1 %v1542_v48 }
 0x4bf   :  { %v688_v40 = vpop.f32.mrf.mxu1 }
 0x4c0   :  { %v689_v41 = vadd.f32 %v1189_v39, %v688_v40 }
 0x4c1   :  { %v1407_v42 = vpop.f32.mrf.mxu1 }
 0x4c2   :  { %v694_v43 = vmax.f32 %v689_v41, 0.0 }
 0x4c3   :  { %v691_v44 = vpop.f32.mrf.mxu1 }
 0x4c4   :  { %v695_v45 = vpack.c.bf16 %v694_v43, %v694_v43 }
 0x4c5   :  { %v1408_v46 = vpop.f32.mrf.mxu1 }
 0x4c6   :  { %1426 = vmatmul.mubr.bf16.vlgmr.msra.gmra.mxu0 %v695_v45 }
 0x4c7   :  { %1457 = vmatprep.mubr.msk.bf16.mxu0 %vm1597_vm0, %v1596_v0  ;;  %1450 = vmatpush3.bf16.msra.mxu0 %v1543_v49 }
 0x4c8   :  { %1451 = vmatprep.subr.bf16.mxu0 %v1596_v0 }
 0x4cb   :  { %1452 = vmatpush3.bf16.msra.mxu0 %v1544_v51 }
 0x4cc   :  { %1453 = vmatprep.subr.bf16.mxu0 %v1596_v0 }
 0x4cf   :  { %1454 = vmatpush3.bf16.msra.mxu0 %v1545_v3 }
 0x4d0   :  { %1455 = vmatprep.subr.bf16.mxu0 %v1596_v0 }
 0x4d3   :  { %1456 = vmatpush3.bf16.msra.mxu0 %v1546_v4 }
 0x4d4   :  { %1461 = vmatprep.subr.bf16.mxu0 %v1596_v0 }
 0x586   :  { %v803_v57 = vpop.f32.mrf.mxu0 }
 0x587   :  { %v804_v58 = vadd.f32 %v1199_v56, %v803_v57 }
 0x588   :  { %v1427_v60 = vpop.f32.mrf.mxu0 }
 0x589   :  { %v810_v61 = vadd.f32 %v809_v59, %v804_v58 }
 0x58a   :  { %v806_v62 = vpop.f32.mrf.mxu0 }
 0x58b   :  { %v811_v63 = vmax.f32 %v810_v61, 0.0 }
 0x58c   :  { %v1428_v1 = vpop.f32.mrf.mxu0 }
 0x58d   :  { %v812_v2 = vpack.c.bf16 %v811_v63, %v811_v63 }
 0x58f   :  { %1446 = vmatmul.mubr.bf16.vlgmr.msra.gmra.mxu1 %v812_v2 }
 0x64f   :  { %v918_v5 = vpop.f32.mrf.mxu1 }
 0x650   :  { %v919_v6 = vadd.f32 %v918_v5, %v834_v55 }
 0x651   :  { %v1447_v7 = vpop.f32.mrf.mxu1 }
 0x652   :  { %v924_v8 = vmax.f32 %v919_v6, 0.0 }
 0x653   :  { %v921_v9 = vpop.f32.mrf.mxu1 }
 0x654   :  { %v925_v10 = vpack.c.bf16 %v924_v8, %v924_v8 }
 0x655   :  { %v1448_v11 = vpop.f32.mrf.mxu1 }
 0x656   :  { %1458 = vmatmul.mubr.msk.bf16.vlgmr.msra.gmra.mxu0 %vm961_vm2, %v925_v10 }
 0x657   :  { %1465 = vmatprep.mubr.msk.bf16.mxu0 %vm1597_vm0, %v1596_v0  ;;  %1462 = vmatpush3.bf16.msra.mxu0 %v1547_v12 }
 0x658   :  { %1463 = vmatprep.subr.bf16.mxu0 %v1596_v0 }
 0x65b   :  { %1464 = vmatpush3.bf16.msra.mxu0 %v1548_v13 }
 0x65c   :  { %1469 = vmatprep.subr.bf16.mxu0 %v1596_v0 }
 0x716   :  { %v999_v15 = vpop.f32.mrf.mxu0 }
 0x717   :  { %v1000_v16 = vadd.f32 %v999_v15, %v959_v14 }
 0x718   :  { %v1459_v17 = vpop.f32.mrf.mxu0 }
 0x719   :  { %v1005_v18 = vmax.f32 %v1000_v16, 0.0 }
 0x71a   :  { %v1002_v19 = vpop.f32.mrf.mxu0 }
 0x71b   :  { %v1006_v20 = vpack.c.bf16 %v1005_v18, %v1005_v18 }
 0x71c   :  { %v1460_v21 = vpop.f32.mrf.mxu0 }
 0x71d   :  { %1466 = vmatmul.mubr.msk.bf16.vlgmr.msra.gmra.mxu0 %vm72_vm1, %v1006_v20 }
 0x71e   :  { %1471 = vmatprep.mubr.msk.bf16.mxu0 %vm1597_vm0, %v1596_v0  ;;  %v1074_v0 = vpop.permute.xlu1 %1073 }
 0x71f   :  { %v1079_v33 = vrot.slane %v1074_v0, %v833_v54 }
 0x7dd   :  { %v1063_v24 = vpop.f32.mrf.mxu0 }
 0x7de   :  { %v1064_v25 = vadd.f32 %v1063_v24, %v1024_v23 }
 0x7df   :  { %v1467_v26 = vpop.f32.mrf.mxu0 }
 0x7e0   :  { %v1069_v27 = vmax.f32 %v1064_v25, 0.0 }
 0x7e1   :  { %v1066_v28 = vpop.f32.mrf.mxu0 }
 0x7e2   :  { %v1070_v29 = vpack.c.bf16 %v1069_v27, %v1069_v27 }
 0x7e3   :  { %v1468_v30 = vpop.f32.mrf.mxu0 }
 0x7e4   :  { %v1085_v31 = vsel %vm1080_vm3, %v1070_v29, 0 }
 0x7e5   :  { %1470 = vmatpush3.bf16.xpose.msra.mxu0 %v1085_v31 }
 0x7ec   :  { %1472 = vmatmul.mubr.msk.bf16.vlgmr.msra.gmra.mxu0 %vm1080_vm3, %v1071_v32 }
 0x8ac   :  { %v1121_v34 = vpop.f32.mrf.mxu0 }
 0x8ad   :  { %v1122_v35 = vadd.f32 %v1121_v34, %v1079_v33 }
 0x8ae   :  { %v1473_v36 = vpop.f32.mrf.mxu0 }
 0x8af   :  { %1128 = vst.msk [vmem:[#allocation5] sm:$0x1] %vm1127_vm4, %v1122_v35 }
 0x8b0   :  { %v1124_v37 = vpop.f32.mrf.mxu0 }
 0x8b1   :  { %1580 = shalt.err (!%p1577_p9)
}
 0x8b2   :  { %1138 = dma.vmem_to_hbm [thread:$0]  %s1136_s2, 16, %s1851_s9, [#allocation4]   ;;  %v1474_v38 = vpop.f32.mrf.mxu0 }
 0x8b3   :  { %1591 = dma.done.wait [#allocation4], 16  }
 0x8b4   :  { %1592 = vsyncadd [#allocation4], 4294967280 }
 0x8b5   :  { %1142 = vsyncpa [#allocation3], 1 }
 0x8b6   :  { %1143 = vsyncpa [#allocation4], 1 }

</bundles_post_ra>
